<compile_context>
chip_gen: v5e
topology: v5e:2x2
jax: 0.10.0
libtpu: 0.0.40
codegen_flags: <defaults>
</compile_context>

<pallas_src>
import functools

import jax
import jax.numpy as jnp
from jax.experimental import pallas as pl
from jax.experimental.pallas import tpu as pltpu


def _round_up(x, m):
    return (x + m - 1) // m * m


def _sublane_multiple(dtype):
    # Minimum second-to-last tile dim: f32 -> 8, bf16 -> 16, int8/fp8 -> 32.
    return 8 * max(1, 4 // jnp.dtype(dtype).itemsize)


def _pmodel_kernel(z_ref, w1_ref, b1_ref, w2_ref, b2_ref, o_ref):
    # First Linear + ReLU (MXU matmul, f32 accumulate).
    h = jnp.dot(z_ref[...].astype(w1_ref.dtype), w1_ref[...],
                preferred_element_type=jnp.float32)
    h = jnp.maximum(h + b1_ref[...], 0.0)          # (bm, H) + (1, H), f32 VPU
    # Second Linear + Sigmoid.
    y = jnp.dot(h.astype(w2_ref.dtype), w2_ref[...],
                preferred_element_type=jnp.float32)
    y = y + b2_ref[...]                            # (bm, D) + (1, D), f32
    o_ref[...] = jax.nn.sigmoid(y).astype(o_ref.dtype)   # exp on EUP slot


@functools.partial(jax.jit, static_argnames=("block_m",))
def pmodel_forward(z, w1, b1, w2, b2, *, block_m=512):
    """z: (B, latent), w1: (latent, hidden), b1: (hidden,),
       w2: (hidden, input_dim), b2: (input_dim,) -> (B, input_dim)."""
    B, L = z.shape
    H = w1.shape[1]
    D = w2.shape[1]

    # ---- batch tile: dtype-aligned sublanes; prefer >=2 grid steps so the
    #      two v7x TensorCores can both be used (no-op on single-TC chips).
    align = _sublane_multiple(z.dtype)
    bm = max(align, _round_up(min(block_m, B), align))
    if B > align and pl.cdiv(B, bm) < 2:
        bm = max(align, _round_up(pl.cdiv(B, 2), align))
    grid_m = pl.cdiv(B, bm)

    # Biases as (1, N) rows so they broadcast over the batch tile.
    b1_2d = b1.reshape(1, H)
    b2_2d = b2.reshape(1, D)

    # ---- VMEM budget: every pipelined input/output block is double-buffered
    #      (including the constant-index weights); cap at 80% of the real
    #      device VMEM (64 MiB on v7x, 128 MiB on v5e/v6e).
    zs = jnp.dtype(z.dtype).itemsize
    ws = jnp.dtype(w1.dtype).itemsize
    vmem_needed = (
        2 * bm * L * zs          # z tile         (double buffered)
        + 2 * (L * H + H) * ws   # W1 + b1        (double buffered)
        + 2 * (H * D + D) * ws   # W2 + b2        (double buffered)
        + 2 * bm * D * zs        # output tile    (double buffered)
        + bm * H * 4             # f32 hidden intermediate
        + bm * D * 4             # f32 logits before sigmoid
    )
    try:
        vmem_cap = int(pltpu.get_tpu_info().vmem_capacity_bytes)
    except Exception:
        vmem_cap = 64 << 20      # most restrictive (v7x) as fallback
    vmem_limit = int(min(max(int(vmem_needed * 1.5) + (2 << 20), 16 << 20),
                         int(vmem_cap * 0.8)))

    cost = pl.CostEstimate(
        flops=2 * B * (L * H + H * D),
        transcendentals=B * D,   # sigmoid (advisory)
        bytes_accessed=zs * (B * L + B * D)
        + ws * (L * H + H + H * D + D),
    )

    return pl.pallas_call(
        _pmodel_kernel,
        out_shape=jax.ShapeDtypeStruct((B, D), z.dtype),
        grid_spec=pltpu.PrefetchScalarGridSpec(
            num_scalar_prefetch=0,
            grid=(grid_m,),
            in_specs=[
                pl.BlockSpec((bm, L), lambda i: (i, 0)),   # z tile over batch
                pl.BlockSpec((L, H), lambda i: (0, 0)),    # W1 (resident)
                pl.BlockSpec((1, H), lambda i: (0, 0)),    # b1
                pl.BlockSpec((H, D), lambda i: (0, 0)),    # W2 (resident)
                pl.BlockSpec((1, D), lambda i: (0, 0)),    # b2
            ],
            # Full-array D in the out block (no lane padding): masked stores
            # cost store slots, but HBM write bandwidth is the scarce resource.
            out_specs=pl.BlockSpec((bm, D), lambda i: (i, 0)),
        ),
        compiler_params=pltpu.CompilerParams(
            dimension_semantics=("parallel",),
            vmem_limit_bytes=vmem_limit,
        ),
        cost_estimate=cost,
    )(z, w1, b1_2d, w2, b2_2d)
    # TODO(synk): for large models, add an N-tiling grid axis over D (W2/b2/out
    # blocks) so weights need not stay fully VMEM-resident.


def init_params(key, input_dim, hidden_dim, latent_dim, dtype=jnp.float32):
    """Deterministic PyTorch-nn.Linear-style uniform init (transposed layout)."""
    k1, k2, k3, k4 = jax.random.split(key, 4)
    lim1 = 1.0 / jnp.sqrt(latent_dim)
    lim2 = 1.0 / jnp.sqrt(hidden_dim)
    w1 = jax.random.uniform(k1, (latent_dim, hidden_dim), dtype, -lim1, lim1)
    b1 = jax.random.uniform(k2, (hidden_dim,), dtype, -lim1, lim1)
    w2 = jax.random.uniform(k3, (hidden_dim, input_dim), dtype, -lim2, lim2)
    b2 = jax.random.uniform(k4, (input_dim,), dtype, -lim2, lim2)
    return w1, b1, w2, b2


if __name__ == "__main__":
    # Small shapes consistent with PModel(input_dim, hidden_dim, latent_dim).
    # batch=100 is intentionally ragged: grid=(2,) with bm=56, last block's
    # reads/writes are clipped/masked by Pallas (no wrapper pad or slice).
    batch, input_dim, hidden_dim, latent_dim = 100, 64, 32, 16

    key = jax.random.PRNGKey(0)
    kz, kp = jax.random.split(key)
    z = jax.random.normal(kz, (batch, latent_dim), dtype=jnp.float32)
    w1, b1, w2, b2 = init_params(kp, input_dim, hidden_dim, latent_dim)

    out = pmodel_forward(z, w1, b1, w2, b2)
    out = jax.block_until_ready(out)

    # Pure-JAX reference check.
    ref = jax.nn.sigmoid(jnp.maximum(z @ w1 + b1, 0.0) @ w2 + b2)
    assert out.shape == (batch, input_dim)
    assert jnp.allclose(out, ref, atol=1e-5, rtol=1e-5), float(
        jnp.max(jnp.abs(out - ref)))

    # Also exercise the single-block path (tiny batch, grid=1).
    z_small = z[:8]
    out_small = jax.block_until_ready(pmodel_forward(z_small, w1, b1, w2, b2))
    ref_small = jax.nn.sigmoid(jnp.maximum(z_small @ w1 + b1, 0.0) @ w2 + b2)
    assert jnp.allclose(out_small, ref_small, atol=1e-5, rtol=1e-5)

    # And an explicit small tile (grid=4) to exercise multi-step pipelining.
    out_tiled = jax.block_until_ready(
        pmodel_forward(z, w1, b1, w2, b2, block_m=32))
    assert jnp.allclose(out_tiled, ref, atol=1e-5, rtol=1e-5)

    print("KERNEL_OK")
</pallas_src>

<mosaic_0001>
module attributes {stable_mosaic.version = 11 : i64} {
  func.func @_pmodel_kernel(%arg0: i32, %arg1: memref<56x16xf32, #tpu.memory_space<vmem>>, %arg2: memref<16x32xf32, #tpu.memory_space<vmem>>, %arg3: memref<1x32xf32, #tpu.memory_space<vmem>>, %arg4: memref<32x64xf32, #tpu.memory_space<vmem>>, %arg5: memref<1x64xf32, #tpu.memory_space<vmem>>, %arg6: memref<56x64xf32, #tpu.memory_space<vmem>>) attributes {dimension_semantics = [#tpu.dimension_semantics<parallel>], iteration_bounds = array<i64: 2>, scalar_prefetch = 0 : i64, scratch_operands = 0 : i64, tpu.core_type = #tpu.core_type<tc>, window_params = [{transform_indices = @transform_0, window_bounds = array<i64: 56, 16>}, {pipeline_mode = #tpu.pipeline_mode<synchronous>, transform_indices = @transform_1, window_bounds = array<i64: 16, 32>}, {pipeline_mode = #tpu.pipeline_mode<synchronous>, transform_indices = @transform_2, window_bounds = array<i64: 1, 32>}, {pipeline_mode = #tpu.pipeline_mode<synchronous>, transform_indices = @transform_3, window_bounds = array<i64: 32, 64>}, {pipeline_mode = #tpu.pipeline_mode<synchronous>, transform_indices = @transform_4, window_bounds = array<i64: 1, 64>}, {transform_indices = @transform_5, window_bounds = array<i64: 56, 64>}]} {
    %c0 = arith.constant 0 : index
    %c0_0 = arith.constant 0 : index
    %0 = vector.load %arg1[%c0, %c0_0] : memref<56x16xf32, #tpu.memory_space<vmem>>, vector<56x16xf32>
    %c0_1 = arith.constant 0 : index
    %c0_2 = arith.constant 0 : index
    %1 = vector.load %arg2[%c0_1, %c0_2] : memref<16x32xf32, #tpu.memory_space<vmem>>, vector<16x32xf32>
    %cst = arith.constant dense<0.000000e+00> : vector<56x32xf32>
    %2 = tpu.matmul %0, %1, %cst {dimension_numbers = #tpu.dot_dimension_numbers<[1], [0], [0], [1], [0, 0, 1, 1], [], []>} : vector<56x16xf32>, vector<16x32xf32>, vector<56x32xf32> -> vector<56x32xf32>
    %c0_3 = arith.constant 0 : index
    %c0_4 = arith.constant 0 : index
    %3 = vector.load %arg3[%c0_3, %c0_4] : memref<1x32xf32, #tpu.memory_space<vmem>>, vector<1x32xf32>
    %4 = vector.broadcast %3 : vector<1x32xf32> to vector<56x32xf32>
    %5 = arith.addf %2, %4 : vector<56x32xf32>
    %cst_5 = arith.constant 0.000000e+00 : f32
    %6 = vector.broadcast %cst_5 : f32 to vector<56x32xf32>
    %7 = arith.maximumf %5, %6 : vector<56x32xf32>
    %c0_6 = arith.constant 0 : index
    %c0_7 = arith.constant 0 : index
    %8 = vector.load %arg4[%c0_6, %c0_7] : memref<32x64xf32, #tpu.memory_space<vmem>>, vector<32x64xf32>
    %cst_8 = arith.constant dense<0.000000e+00> : vector<56x64xf32>
    %9 = tpu.matmul %7, %8, %cst_8 {dimension_numbers = #tpu.dot_dimension_numbers<[1], [0], [0], [1], [0, 0, 1, 1], [], []>} : vector<56x32xf32>, vector<32x64xf32>, vector<56x64xf32> -> vector<56x64xf32>
    %c0_9 = arith.constant 0 : index
    %c0_10 = arith.constant 0 : index
    %10 = vector.load %arg5[%c0_9, %c0_10] : memref<1x64xf32, #tpu.memory_space<vmem>>, vector<1x64xf32>
    %11 = vector.broadcast %10 : vector<1x64xf32> to vector<56x64xf32>
    %12 = arith.addf %9, %11 : vector<56x64xf32>
    %13 = arith.negf %12 : vector<56x64xf32>
    %14 = math.exp %13 : vector<56x64xf32>
    %cst_11 = arith.constant 1.000000e+00 : f32
    %15 = vector.broadcast %cst_11 : f32 to vector<56x64xf32>
    %16 = arith.addf %15, %14 : vector<56x64xf32>
    %17 = arith.divf %15, %16 : vector<56x64xf32>
    %c0_12 = arith.constant 0 : index
    %c0_13 = arith.constant 0 : index
    %18 = vector.load %arg6[%c0_12, %c0_13] : memref<56x64xf32, #tpu.memory_space<vmem>>, vector<56x64xf32>
    tpu.vector_store %arg6[%c0_12, %c0_13], %17 {strides = array<i32>} : memref<56x64xf32, #tpu.memory_space<vmem>>, vector<56x64xf32>,
    return
  }
  func.func @transform_0(%arg0: i32) -> (i32, i32) {
    %c0_i32 = arith.constant 0 : i32
    %c0_i32_0 = arith.constant 0 : i32
    return %arg0, %c0_i32 : i32, i32
  }
  func.func @transform_1(%arg0: i32) -> (i32, i32) {
    %c0_i32 = arith.constant 0 : i32
    %c0_i32_0 = arith.constant 0 : i32
    %c0_i32_1 = arith.constant 0 : i32
    return %c0_i32, %c0_i32_0 : i32, i32
  }
  func.func @transform_2(%arg0: i32) -> (i32, i32) {
    %c0_i32 = arith.constant 0 : i32
    %c0_i32_0 = arith.constant 0 : i32
    %c0_i32_1 = arith.constant 0 : i32
    return %c0_i32, %c0_i32_0 : i32, i32
  }
  func.func @transform_3(%arg0: i32) -> (i32, i32) {
    %c0_i32 = arith.constant 0 : i32
    %c0_i32_0 = arith.constant 0 : i32
    %c0_i32_1 = arith.constant 0 : i32
    return %c0_i32, %c0_i32_0 : i32, i32
  }
  func.func @transform_4(%arg0: i32) -> (i32, i32) {
    %c0_i32 = arith.constant 0 : i32
    %c0_i32_0 = arith.constant 0 : i32
    %c0_i32_1 = arith.constant 0 : i32
    return %c0_i32, %c0_i32_0 : i32, i32
  }
  func.func @transform_5(%arg0: i32) -> (i32, i32) {
    %c0_i32 = arith.constant 0 : i32
    %c0_i32_0 = arith.constant 0 : i32
    return %arg0, %c0_i32 : i32, i32
  }
}

</mosaic_0001>

<bundles_post_ra>
// kernel: pmodel_forward.1
= control target key start
LH: loop header
LB: loop body
LE: loop exit
PB: predicated region body
PF: predicated region fallthrough
CT: control target
= control target key end

     0   :  { %s1066_s18 = smov 0   ;;  %s1068_s19 = smov 0   ;;  %s1211_s0 = inlined_call_operand.vmem [shape: f32[100,16], index: 0, kind: input, shape index: {}]   ;;  %s1212_s1 = inlined_call_operand.vmem [shape: f32[16,32], index: 1, kind: input, shape index: {}]   ;;  %s1213_s2 = inlined_call_operand.vmem [shape: f32[1,32], index: 2, kind: input, shape index: {}]   ;;  %s1214_s3 = inlined_call_operand.vmem [shape: f32[32,64], index: 3, kind: input, shape index: {}]   ;;  %s1215_s4 = inlined_call_operand.vmem [shape: f32[1,64], index: 4, kind: input, shape index: {}]   ;;  %s1216_s5 = inlined_call_operand.vmem [shape: f32[100,64], index: 5, kind: output, shape index: {}]  }
   0x1   :  { %s1070_s20 = smov 0  }
   0x2 LB: > { %s1079_s21 = sadd.s32 4294967295, %s1002_s20   ;;  %s1081_s22 = sadd.s32 1, %s1002_s20   ;;  %s1002_s20 = sphi %s1070_s20, %s1223_s20   ;;  %s998_s19 = sphi %s1068_s19, %s1222_s19   ;;  %s994_s18 = sphi %s1066_s18, %s1221_s18  }
   0x3   : > { %s129_s23 = ssub.s32 %s1002_s20, %s1081_s22  ;;  %s132_s24 = sadd.s32 1, %s998_s19 }
   0x4   : > { %p130_p0 = scmp.eq.s32.totalorder %s129_s23, 0  ;;  %p142_p1 = scmp.ne.s32.totalorder %s998_s19, %s994_s18 }
   0x5   : > { %p143_p2 = scmp.eq.s32.totalorder %s1079_s21, 1  ;;  %p780_p3 = scmp.ge.s32.totalorder %s1002_s20, 1 }
   0x6   : > { %s1089_s25 = scalar_select %p130_p0, %s998_s19, %s132_s24  }
   0x7   : > { %p1091_p4 = por %p143_p2, %p142_p1  ;;  %p196_p5 = scmp.lt.s32.totalorder %s1002_s20, 3 }
   0x9   : > { %p197_p6 = pnand %p780_p3, %p196_p5 }
   0xa   : > { %s1102_s6 = smul.u32 (!%p197_p6), 7, %s1079_s21  ;;  %s224_s30 = sand.u32 (!%p197_p6), 1, %s994_s18  }
   0xb   : > { %200 = sbr.rel (%p197_p6) target bundleno = 396 (0x18c), region = 40 }
   0xc   : > { %p232_p7 = scmp.lt.s32.totalorder (!%p197_p6), %s1102_s6, 12  ;;  %s822_s7 = smul.u32 (!%p197_p6), 56, %s224_s30 }
   0xe   : > { %s1135_s18 = scalar_lea.vmem (!%p197_p6), [#allocation2], %s822_s7  }
  0x10   : > { %v254_v0 = vld [vmem:[%s1212_s1 + $0x8] sm:$0xff]  ;;  %v253_v1 = vld [vmem:[%s1212_s1] sm:$0xff]  ;;  %v329_v2 = vld [vmem:[%s1214_s3 + $0x18] sm:$0xff]  ;;  %s233_s9 = scalar_select %p232_p7, %s1102_s6, 12  ;;  %vm259_vm0 = vcmask 130048   ;;  %vm334_vm1 = vcmask 261120  }
  0x11   : > { %295 = vmatpush.msra.mxu0 %v254_v0  ;;  %816 = vmatpush.msra.mxu3 %v254_v0  ;;  %v328_v10 = vld [vmem:[%s1214_s3 + $0x10] sm:$0xff]  ;;  %v327_v11 = vld [vmem:[%s1214_s3 + $0x8] sm:$0xff]  ;;  %v326_v12 = vld [vmem:[%s1214_s3] sm:$0xff]  ;;  %vm527_vm5 = vcmask 523264   ;;  %s543_s8 = ssub.s32 (%p1091_p4), 13, %s1102_s6 }
  0x12   : > { %368 = vmatpush.msra.mxu1 %v329_v2  ;;  %818 = vmatpush.msra.mxu2 %v329_v2  ;;  %s781_s10 = sshll.u32 %s233_s9, 3  ;;  %v912_v13 = vld [vmem:[%s1213_s2] ss:$0 sm:$0xff]  ;;  %s815_s9 = smul.u32 (%p1091_p4), 56, %s1079_s21 }
  0x13   : > { %296 = vmatpush.msra.mxu0 %v253_v1  ;;  %817 = vmatpush.msra.mxu3 %v253_v1  ;;  %s235_s13 = scalar_lea.vmem %s1211_s0, %s781_s10  ;;  %v913_v35 = vld [vmem:[%s1215_s4] ss:$0 sm:$0xff]  ;;  %p544_p8 = scmp.lt.s32.totalorder (%p1091_p4), %s543_s8, 7 }
  0x14   : > { %v246_v3 = vld [vmem:[%s235_s13] sm:$0xff]  ;;  %v247_v5 = vld [vmem:[%s235_s13 + $0x8] sm:$0xff]  ;;  %v248_v7 = vld [vmem:[%s235_s13 + $0x10] sm:$0xff]  ;;  %369 = vmatpush.msra.mxu1 %v328_v10  ;;  %819 = vmatpush.msra.mxu2 %v328_v10  ;;  %s1158_s12 = scalar_lea.vmem (%p1091_p4), %s1216_s5, %s815_s9  }
  0x15   : > { %v250_v4 = vld [vmem:[%s235_s13 + $0x20] sm:$0xff]  ;;  %782 = vmatmul.msk.f32.vlgmr.msra.gmra.mxu0 %vm259_vm0, %v246_v3  ;;  %v251_v6 = vld [vmem:[%s235_s13 + $0x28] sm:$0xff]  ;;  %v252_v8 = vld [vmem:[%s235_s13 + $0x30] sm:$0xff] }
  0x16   : > { %786 = vmatmul.msk.f32.vlgmr.msra.gmra.mxu3 %vm259_vm0, %v250_v4  ;;  %v249_v9 = vld [vmem:[%s235_s13 + $0x18] sm:$0xff]  ;;  %370 = vmatpush.msra.mxu1 %v327_v11 }
  0x17   : > { %820 = vmatpush.msra.mxu2 %v327_v11 }
  0x18   : > { %371 = vmatpush.msra.mxu1 %v326_v12 }
  0x19   : > { %821 = vmatpush.msra.mxu2 %v326_v12 }
  0x1d   : > { %783 = vmatmul.msk.f32.gmra.mxu0 %vm259_vm0, %v247_v5 }
  0x1e   : > { %787 = vmatmul.msk.f32.gmra.mxu3 %vm259_vm0, %v251_v6 }
  0x25   : > { %784 = vmatmul.msk.f32.gmra.mxu0 %vm259_vm0, %v248_v7 }
  0x26   : > { %788 = vmatmul.msk.f32.gmra.mxu3 %vm259_vm0, %v252_v8 }
  0x2d   : > { %785 = vmatmul.msk.f32.gmra.mxu0 %vm259_vm0, %v249_v9 }
  0x92   : > { %v298_v14 = vpop.f32.mrf.mxu0 }
  0x93   : > { %v299_v15 = vadd.f32 %v912_v13, %v298_v14 }
  0x95   : > { %v319_v16 = vmax.f32 %v299_v15, 0.0 }
  0x97   : > { %789 = vmatmul.msk.f32.vlgmr.msra.gmra.mxu1 %vm334_vm1, %v319_v16 }
  0x99   : > { %v310_v17 = vpop.f32.mrf.mxu3 }
  0x9a   : > { %v311_v18 = vadd.f32 %v912_v13, %v310_v17  ;;  %v301_v19 = vpop.f32.mrf.mxu0 }
  0x9b   : > { %v302_v21 = vadd.f32 %v912_v13, %v301_v19 }
  0x9c   : > { %v323_v20 = vmax.f32 %v311_v18, 0.0 }
  0x9d   : > { %v320_v22 = vmax.f32 %v302_v21, 0.0 }
  0x9e   : > { %793 = vmatmul.msk.f32.vlgmr.msra.gmra.mxu2 %vm334_vm1, %v323_v20 }
  0x9f   : > { %790 = vmatmul.msk.f32.gmra.mxu1 %vm334_vm1, %v320_v22 }
  0xa1   : > { %v313_v23 = vpop.f32.mrf.mxu3 }
  0xa2   : > { %v314_v24 = vadd.f32 %v912_v13, %v313_v23  ;;  %v304_v25 = vpop.f32.mrf.mxu0 }
  0xa3   : > { %v305_v27 = vadd.f32 %v912_v13, %v304_v25 }
  0xa4   : > { %v324_v26 = vmax.f32 %v314_v24, 0.0 }
  0xa5   : > { %v321_v28 = vmax.f32 %v305_v27, 0.0 }
  0xa6   : > { %794 = vmatmul.msk.f32.gmra.mxu2 %vm334_vm1, %v324_v26 }
  0xa7   : > { %791 = vmatmul.msk.f32.gmra.mxu1 %vm334_vm1, %v321_v28 }
  0xa9   : > { %v316_v29 = vpop.f32.mrf.mxu3 }
  0xaa   : > { %v317_v30 = vadd.f32 %v912_v13, %v316_v29  ;;  %v307_v31 = vpop.f32.mrf.mxu0 }
  0xab   : > { %v308_v33 = vadd.f32 %v912_v13, %v307_v31 }
  0xac   : > { %v325_v32 = vmax.f32 %v317_v30, 0.0 }
  0xad   : > { %v322_v34 = vmax.f32 %v308_v33, 0.0 }
  0xae   : > { %795 = vmatmul.msk.f32.gmra.mxu2 %vm334_vm1, %v325_v32 }
  0xaf   : > { %792 = vmatmul.msk.f32.gmra.mxu1 %vm334_vm1, %v322_v34 }
 0x114   : > { %v373_v36 = vpop.f32.mrf.mxu1 }
 0x115   : > { %v374_v37 = vadd.f32 %v913_v35, %v373_v36 }
 0x117   : > { %v796_v38 = vmul.f32 -1.442695, %v374_v37 }
 0x119   : > { %914 = vpow2.f32 %v796_v38 }
 0x11c   : > { %v376_v39 = vpop.f32.mrf.mxu1 }
 0x11d   : > { %v377_v40 = vadd.f32 %v913_v35, %v376_v39 }
 0x11f   : > { %v915_v41 = vpop.eup %914  ;;  %v797_v42 = vmul.f32 -1.442695, %v377_v40 }
 0x120   : > { %v415_v43 = vadd.f32 1.0, %v915_v41 }
 0x121   : > { %v385_v44 = vpop.f32.mrf.mxu2  ;;  %916 = vpow2.f32 %v797_v42 }
 0x122   : > { %v386_v45 = vadd.f32 %v913_v35, %v385_v44  ;;  %918 = vrcp.f32 %v415_v43  ;;  %v431_v59 = vand.u32 2147483647, %v415_v43  ;;  %v433_v60 = vand.u32 2147483648, %v415_v43 }
 0x123   : > { %vm427_vm3 = vweird.f32 %v415_v43 }
 0x124   : > { %v800_v46 = vmul.f32 -1.442695, %v386_v45  ;;  %v379_v47 = vpop.f32.mrf.mxu1  ;;  %v434_v5 = vor.u32 1.1754944e-38, %v433_v60  ;;  %vm432_vm6 = vcmp.eq.f32.partialorder %v431_v59, 8.507059e+37 }
 0x125   : > { %v380_v48 = vadd.f32 %v913_v35, %v379_v47 }
 0x126   : > { %920 = vpow2.f32 %v800_v46 }
 0x127   : > { %v917_v49 = vpop.eup %916  ;;  %v798_v50 = vmul.f32 -1.442695, %v380_v48 }
 0x128   : > { %v919_v51 = vpop.eup %918  ;;  %v416_v52 = vadd.f32 1.0, %v917_v49 }
 0x129   : > { %v388_v53 = vpop.f32.mrf.mxu2  ;;  %v423_v54 = vmul.f32 %v919_v51, %v415_v43  ;;  %922 = vpow2.f32 %v798_v50  ;;  %vm428_vm2 = vweird.f32 %v919_v51 }
 0x12a   : > { %v389_v55 = vadd.f32 %v913_v35, %v388_v53  ;;  %924 = vrcp.f32 %v416_v52  ;;  %vm429_vm4 = vmor %vm427_vm3, %vm428_vm2  ;;  %v446_v13 = vand.u32 2147483647, %v416_v52  ;;  %v448_v16 = vand.u32 2147483648, %v416_v52 }
 0x12b   : > { %v424_v57 = vsub.f32 1.0, %v423_v54  ;;  %vm442_vm8 = vweird.f32 %v416_v52 }
 0x12c   : > { %v921_v56 = vpop.eup %920  ;;  %v801_v58 = vmul.f32 -1.442695, %v389_v55  ;;  %v382_v62 = vpop.f32.mrf.mxu1  ;;  %vm447_vm9 = vcmp.eq.f32.partialorder %v446_v13, 8.507059e+37  ;;  %v449_v25 = vor.u32 1.1754944e-38, %v448_v16 }
 0x12d   : > { %v419_v61 = vadd.f32 1.0, %v921_v56  ;;  %v425_v63 = vmul.f32 %v919_v51, %v424_v57  ;;  %v383_v0 = vadd.f32 %v913_v35, %v382_v62 }
 0x12e   : > { %926 = vpow2.f32 %v801_v58 }
 0x12f   : > { %928 = vrcp.f32 %v419_v61  ;;  %v923_v1 = vpop.eup %922  ;;  %v426_v2 = vadd.f32 %v919_v51, %v425_v63  ;;  %v799_v3 = vmul.f32 -1.442695, %v383_v0  ;;  %v491_v26 = vand.u32 2147483647, %v419_v61 }
 0x130   : > { %v925_v4 = vpop.eup %924  ;;  %v417_v6 = vadd.f32 1.0, %v923_v1  ;;  %v493_v27 = vand.u32 2147483648, %v419_v61  ;;  %vm487_vm12 = vweird.f32 %v419_v61 }
 0x131   : > { %v391_v7 = vpop.f32.mrf.mxu2  ;;  %v430_v8 = vsel %vm429_vm4, %v919_v51, %v426_v2  ;;  %v438_v9 = vmul.f32 %v925_v4, %v416_v52  ;;  %930 = vpow2.f32 %v799_v3  ;;  %vm443_vm7 = vweird.f32 %v925_v4 }
 0x132   : > { %v435_v10 = vsel %vm432_vm6, %v434_v5, %v430_v8  ;;  %932 = vrcp.f32 %v417_v6  ;;  %v392_v14 = vadd.f32 %v913_v35, %v391_v7  ;;  %vm444_vm10 = vmor %vm442_vm8, %vm443_vm7  ;;  %vm492_vm14 = vcmp.eq.f32.partialorder %v491_v26, 8.507059e+37 }
 0x133   : > { %528 = vst.msk [vmem:[%s1135_s18] sm:$0xff] %vm527_vm5, %v435_v10  ;;  %v439_v12 = vsub.f32 1.0, %v438_v9  ;;  %v494_v36 = vor.u32 1.1754944e-38, %v493_v27  ;;  %v461_v37 = vand.u32 2147483647, %v417_v6  ;;  %v463_v38 = vand.u32 2147483648, %v417_v6 }
 0x134   : > { %v927_v11 = vpop.eup %926  ;;  %v802_v23 = vmul.f32 -1.442695, %v392_v14  ;;  %vm457_vm0 = vweird.f32 %v417_v6 }
 0x135   : > { %v929_v15 = vpop.eup %928  ;;  %v420_v17 = vadd.f32 1.0, %v927_v11  ;;  %v440_v18 = vmul.f32 %v925_v4, %v439_v12  ;;  %vm462_vm2 = vcmp.eq.f32.partialorder %v461_v37, 8.507059e+37  ;;  %v464_v46 = vor.u32 1.1754944e-38, %v463_v38 }
 0x136   : > { %v483_v19 = vmul.f32 %v929_v15, %v419_v61  ;;  %vm488_vm11 = vweird.f32 %v929_v15 }
 0x137   : > { %934 = vrcp.f32 %v420_v17  ;;  %v931_v20 = vpop.eup %930  ;;  %v441_v21 = vadd.f32 %v925_v4, %v440_v18  ;;  %vm489_vm13 = vmor %vm487_vm12, %vm488_vm11  ;;  %v506_v47 = vand.u32 2147483647, %v420_v17  ;;  %v508_v48 = vand.u32 2147483648, %v420_v17 }
 0x138   : > { %v484_v22 = vsub.f32 1.0, %v483_v19  ;;  %v933_v24 = vpop.eup %932  ;;  %v418_v28 = vadd.f32 1.0, %v931_v20  ;;  %vm502_vm4 = vweird.f32 %v420_v17 }
 0x139   : > { %v445_v29 = vsel %vm444_vm10, %v925_v4, %v441_v21  ;;  %v453_v31 = vmul.f32 %v933_v24, %v417_v6  ;;  %vm458_vm15 = vweird.f32 %v933_v24  ;;  %vm507_vm7 = vcmp.eq.f32.partialorder %v506_v47, 8.507059e+37 }
 0x13a   : > { %v485_v30 = vmul.f32 %v929_v15, %v484_v22  ;;  %v450_v32 = vsel %vm447_vm9, %v449_v25, %v445_v29  ;;  %936 = vrcp.f32 %v418_v28  ;;  %vm459_vm1 = vmor %vm457_vm0, %vm458_vm15  ;;  %v509_v57 = vor.u32 1.1754944e-38, %v508_v48 }
 0x13b   : > { %529 = vst.msk [vmem:[%s1135_s18 + $0x8] sm:$0xff] %vm527_vm5, %v450_v32  ;;  %v454_v34 = vsub.f32 1.0, %v453_v31  ;;  %938 = vpow2.f32 %v802_v23  ;;  %v478_v58 = vand.u32 2147483648, %v418_v28  ;;  %v476_v61 = vand.u32 2147483647, %v418_v28 }
 0x13c   : > { %v486_v33 = vadd.f32 %v929_v15, %v485_v30  ;;  %vm472_vm9 = vweird.f32 %v418_v28 }
 0x13d   : > { %v935_v35 = vpop.eup %934  ;;  %v455_v40 = vmul.f32 %v933_v24, %v454_v34  ;;  %v479_v0 = vor.u32 1.1754944e-38, %v478_v58  ;;  %vm477_vm11 = vcmp.eq.f32.partialorder %v476_v61, 8.507059e+37 }
 0x13e   : > { %v490_v39 = vsel %vm489_vm13, %v929_v15, %v486_v33  ;;  %v498_v41 = vmul.f32 %v935_v35, %v420_v17  ;;  %vm503_vm3 = vweird.f32 %v935_v35 }
 0x13f   : > { %v495_v42 = vsel %vm492_vm14, %v494_v36, %v490_v39  ;;  %v456_v43 = vadd.f32 %v933_v24, %v455_v40  ;;  %vm504_vm6 = vmor %vm502_vm4, %vm503_vm3 }
 0x140   : > { %532 = vst.msk [vmem:[%s1135_s18 + $0x20] sm:$0xff] %vm527_vm5, %v495_v42  ;;  %v499_v44 = vsub.f32 1.0, %v498_v41  ;;  %v937_v45 = vpop.eup %936 }
 0x141   : > { %v939_v49 = vpop.eup %938  ;;  %v460_v50 = vsel %vm459_vm1, %v933_v24, %v456_v43  ;;  %v468_v52 = vmul.f32 %v937_v45, %v418_v28  ;;  %vm473_vm8 = vweird.f32 %v937_v45 }
 0x142   : > { %v500_v51 = vmul.f32 %v935_v35, %v499_v44  ;;  %v465_v53 = vsel %vm462_vm2, %v464_v46, %v460_v50  ;;  %v421_v54 = vadd.f32 1.0, %v939_v49  ;;  %vm474_vm10 = vmor %vm472_vm9, %vm473_vm8 }
 0x143   : > { %530 = vst.msk [vmem:[%s1135_s18 + $0x10] sm:$0xff] %vm527_vm5, %v465_v53  ;;  %v469_v56 = vsub.f32 1.0, %v468_v52 }
 0x144   : > { %v501_v55 = vadd.f32 %v935_v35, %v500_v51  ;;  %940 = vrcp.f32 %v421_v54  ;;  %v523_v6 = vand.u32 2147483648, %v421_v54  ;;  %v521_v8 = vand.u32 2147483647, %v421_v54 }
 0x145   : > { %v470_v60 = vmul.f32 %v937_v45, %v469_v56  ;;  %vm517_vm13 = vweird.f32 %v421_v54 }
 0x146   : > { %v505_v59 = vsel %vm504_vm6, %v935_v35, %v501_v55  ;;  %v524_v10 = vor.u32 1.1754944e-38, %v523_v6  ;;  %vm522_vm15 = vcmp.eq.f32.partialorder %v521_v8, 8.507059e+37 }
 0x147   : > { %v510_v62 = vsel %vm507_vm7, %v509_v57, %v505_v59  ;;  %v471_v63 = vadd.f32 %v937_v45, %v470_v60 }
 0x148   : > { %533 = vst.msk [vmem:[%s1135_s18 + $0x28] sm:$0xff] %vm527_vm5, %v510_v62 }
 0x149   : > { %v475_v1 = vsel %vm474_vm10, %v937_v45, %v471_v63 }
 0x14a   : > { %v941_v2 = vpop.eup %940  ;;  %v480_v3 = vsel %vm477_vm11, %v479_v0, %v475_v1 }
 0x14b   : > { %531 = vst.msk [vmem:[%s1135_s18 + $0x18] sm:$0xff] %vm527_vm5, %v480_v3  ;;  %v513_v4 = vmul.f32 %v941_v2, %v421_v54  ;;  %vm518_vm12 = vweird.f32 %v941_v2 }
 0x14c   : > { %vm519_vm14 = vmor %vm517_vm13, %vm518_vm12 }
 0x14d   : > { %v514_v5 = vsub.f32 1.0, %v513_v4 }
 0x14f   : > { %v515_v7 = vmul.f32 %v941_v2, %v514_v5 }
 0x151   : > { %v516_v9 = vadd.f32 %v941_v2, %v515_v7  ;;  %541 = sbr.rel (!%p1091_p4) target bundleno = 396 (0x18c), region = 44 }
 0x153   : > { %v520_v11 = vsel %vm519_vm14, %v941_v2, %v516_v9 }
 0x154   : > { %v525_v12 = vsel %vm522_vm15, %v524_v10, %v520_v11 }
 0x155   : > { %534 = vst.msk [vmem:[%s1135_s18 + $0x30] sm:$0xff] %vm527_vm5, %v525_v12 }
 0x156   : > { %s1225_s8 = smov (!%p544_p8, %s543_s8), 7 }
 0x157   : > { %s803_s13 = sshll.u32 %s1225_s8, 3 }
 0x158   : > { %p806_p9 = scmp.eq.s32.totalorder %s803_s13, 0 }
 0x159   : > { %942 = sdivrem.u32 (!%p806_p9), %s1225_s8, 7 }
 0x15a   : > { %552 = sbr.rel (%p806_p9) target bundleno = 396 (0x18c), region = 48 }
 0x162   : > { %s1164_s26 = spop.drf %942 }
 0x163   : > { %s944_s14 = spop.drf %942  ;;  %p807_p10 = scmp.le.s32.totalorder %s1164_s26, 0 }
 0x164   : > { %s1218_s21 = smov (!%p807_p10), %s1158_s12  ;;  %s1219_s6 = smov (!%p807_p10), %s1135_s18 }
 0x165   : > { %733 = sbr.rel (%p807_p10) target bundleno = 370 (0x172), region = 124  ;;  %s1173_s15 = smov (!%p807_p10), 0  }
 0x166   : > { %s1175_s16 = smov (!%p807_p10), 0  }
 0x16a LB: >> { %v629_v13 = vld [vmem:[%s1010_s6] sm:$0xff]  ;;  %v631_v14 = vld [vmem:[%s1010_s6 + $0x8] sm:$0xff]  ;;  %v633_v15 = vld [vmem:[%s1010_s6 + $0x10] sm:$0xff]  ;;  %s643_s17 = sadd.s32 1, %s1014_s15  ;;  %s623_s16 = sadd.s32 1, %s1018_s16   ;;  %s1018_s16 = sphi %s1175_s16, %s623_s16   ;;  %s1014_s15 = sphi %s1173_s15, %s1220_s15   ;;  %s1010_s6 = sphi %s1219_s6, %s648_s6   ;;  %s1006_s21 = sphi %s1218_s21, %s649_s21  }
 0x16b   : >> { %630 = vst [vmem:[%s1006_s21] sm:$0xff] %v629_v13  ;;  %v635_v16 = vld [vmem:[%s1010_s6 + $0x18] sm:$0xff]  ;;  %p644_p11 = scmp.ge.s32.totalorder %s643_s17, %s1164_s26  ;;  %v637_v17 = vld [vmem:[%s1010_s6 + $0x20] sm:$0xff]  ;;  %v639_v18 = vld [vmem:[%s1010_s6 + $0x28] sm:$0xff]  ;;  %p622_p12 = scmp.ge.s32.totalorder %s623_s16, %s1164_s26 }
 0x16c   : >> { %632 = vst [vmem:[%s1006_s21 + $0x8] sm:$0xff] %v631_v14  ;;  %v641_v19 = vld [vmem:[%s1010_s6 + $0x30] sm:$0xff] }
 0x16d   : >> { %634 = vst [vmem:[%s1006_s21 + $0x10] sm:$0xff] %v633_v15  ;;  %s1227_s17 = smov (%p644_p11, %s643_s17), 0  ;;  %625 = sbr.rel (!%p622_p12) target bundleno = 362 (0x16a), region = 130 }
 0x16e   : >> { %636 = vst [vmem:[%s1006_s21 + $0x18] sm:$0xff] %v635_v16  ;;  %s646_s20 = smul.u32 56, %s1227_s17  ;;  %s1220_s15 = smov %s1227_s17 }
 0x16f   : >> { %638 = vst [vmem:[%s1006_s21 + $0x20] sm:$0xff] %v637_v17 }
 0x170   : >> { %640 = vst [vmem:[%s1006_s21 + $0x28] sm:$0xff] %v639_v18  ;;  %s648_s6 = scalar_lea.vmem %s1135_s18, %s646_s20 [#allocation2]  }
 0x171   : >> { %642 = vst [vmem:[%s1006_s21 + $0x30] sm:$0xff] %v641_v19  ;;  %s649_s21 = scalar_lea.vmem %s1158_s12, %s646_s20  }
 0x172 PF: > { %945 = sdivrem.u32 %s1225_s8, 7 }
 0x173   : > { %s808_s23 = smul.u32 56, %s1164_s26 }
 0x175   : > { %s1196_s24 = scalar_lea.vmem %s1135_s18, %s808_s23 [#allocation2]   ;;  %s656_s27 = scalar_lea.vmem %s1158_s12, %s808_s23  }
 0x17b   : > { %s946_s28 = spop.drf %945 }
 0x17c   : > { %s947_s29 = spop.drf %945 }
 0x17d   : > { %p810_p13 = scmp.le.s32.totalorder %s947_s29, 0 }
 0x17e   : > { %s1020_s30 = smov (!%p810_p13), %s656_s27   ;;  %s1024_s7 = smov (!%p810_p13), %s1196_s24  }
 0x17f   : > { %747 = sbr.rel (%p810_p13) target bundleno = 396 (0x18c), region = 135  ;;  %s1028_s9 = smov (!%p810_p13), 0  }
 0x180   : > { %s1032_s10 = smov (!%p810_p13), 0  }
 0x184 LB: >> { %v666_v20 = vld [vmem:[%s1026_s7] sm:$0xff]  ;;  %s668_s18 = sadd.s32 1, %s1030_s9  ;;  %s660_s10 = sadd.s32 1, %s1034_s10   ;;  %s1034_s10 = sphi %s1032_s10, %s660_s10   ;;  %s1030_s9 = sphi %s1028_s9, %s1029_s9   ;;  %s1026_s7 = sphi %s1024_s7, %s673_s7   ;;  %s1022_s30 = sphi %s1020_s30, %s674_s30  }
 0x185   : >> { %667 = vst [vmem:[%s1022_s30] sm:$0xff] %v666_v20  ;;  %p669_p0 = scmp.ge.s32.totalorder %s668_s18, %s947_s29  ;;  %p659_p1 = scmp.ge.s32.totalorder %s660_s10, %s947_s29 }
 0x187   : >> { %s1229_s18 = smov (%p669_p0, %s668_s18), 0  ;;  %662 = sbr.rel (!%p659_p1) target bundleno = 388 (0x184), region = 141 }
 0x188   : >> { %s811_s8 = sshll.u32 %s1229_s18, 3  ;;  %s1029_s9 = smov %s1229_s18  }
 0x189   : >> { %s673_s7 = scalar_lea.vmem %s1196_s24, %s811_s8 [#allocation2]   ;;  %s674_s30 = scalar_lea.vmem %s656_s27, %s811_s8  }
 0x18c PF: > { %p12_p2 = scmp.ge.s32.totalorder %s1081_s22, 4   ;;  %s1221_s18 = smov %s998_s19 }
 0x18d   : > { %s1222_s19 = smov %s1089_s25  ;;  %s1223_s20 = smov %s1081_s22 }
 0x18e   :  { %14 = sbr.rel (!%p12_p2) target bundleno = 2 (0x2), region = 152 }

</bundles_post_ra>
